<compile_context>
chip_gen: v7x
topology: tpu7x:2x2x1
jax: 0.10.0
libtpu: 0.0.40
codegen_flags: <defaults>
</compile_context>

<pallas_src>
import jax
import jax.numpy as jnp
from jax.experimental import pallas as pl
from jax.experimental.pallas import tpu as pltpu

_LANE = 128


def _outconv_kernel(x_ref, w_ref, b_ref, o_ref):
    # x_ref: (t_n, C_in,  t_rows, 128)  VMEM activation tile (fully packed)
    # w_ref: (C_out*C_in,)              SMEM flattened weights (f32 scalars)
    # b_ref: (C_out,)                   SMEM bias (f32 scalars)
    # o_ref: (t_n, C_out, t_rows, 128)  VMEM output tile (fully packed)
    t_n, c_in = x_ref.shape[0], x_ref.shape[1]
    c_out = o_ref.shape[1]
    for n in range(t_n):              # unrolled: t_n is small & static
        for c in range(c_out):        # unrolled VPU broadcast-FMAs over channels
            acc = x_ref[n, 0].astype(jnp.float32) * w_ref[c * c_in + 0]
            for k in range(1, c_in):
                acc = acc + x_ref[n, k].astype(jnp.float32) * w_ref[c * c_in + k]
            o_ref[n, c] = (acc + b_ref[c]).astype(o_ref.dtype)


def _choose_tiles(n, r, c_in, c_out, itemsize,
                  vmem_data_budget=12 * 1024 * 1024,
                  tiny_bytes=2 * 1024 * 1024):
    """Pick (t_n, t_rows) for blocks of shape (t_n, C, t_rows, 128).

    Tiles are fully packed (128 lanes, t_rows a multiple of 8 or the full R),
    so the per-block cost really is t_rows * 128 * itemsize * (c_in + c_out)
    — no hidden 8-sublane padding factor.
    """
    bytes_per_row = _LANE * itemsize * (c_in + c_out)     # in + out planes, packed
    total_bytes = n * r * bytes_per_row

    # Tiny problem: one grid step (whole thing in one block, N-loop unrolled
    # in-kernel) — per-grid-step overhead (~0.35us) would dominate otherwise.
    if total_bytes <= tiny_bytes:
        return n, r

    # General case: one image per step along N; row tile sized so that the
    # double-buffered (x2) in+out working set stays within the budget.
    max_rows = (vmem_data_budget // 2) // bytes_per_row
    max_rows = max(8, (max_rows // 8) * 8)
    t_rows = min(r, max_rows)
    if t_rows < r:
        t_rows = max(8, (t_rows // 8) * 8)                # multiple of 8; ragged tail masked

    # v7x: make sure there are >= 2 parallel grid steps (2 TensorCores) even
    # for N == 1.  v5e/v6e (1 TC) are unaffected by the extra step.
    if n * ((r + t_rows - 1) // t_rows) < 2 and r > 8:
        half = (-(-r // 2) + 7) // 8 * 8                  # ceil(r/2) rounded up to 8
        if half < r:
            t_rows = half
    return 1, t_rows


def outconv_pallas(x_nchw, weight, bias):
    """1x1 conv, NCHW in / NCHW out.
    x_nchw: (N, C_in, H, W); weight: (C_out, C_in, 1, 1); bias: (C_out,)."""
    N, C_in, H, W = x_nchw.shape
    C_out = weight.shape[0]
    HW = H * W
    HW_p = ((HW + _LANE - 1) // _LANE) * _LANE
    R = HW_p // _LANE

    # Free reshapes (pad only if H*W is not a multiple of 128).
    x3 = x_nchw.reshape(N, C_in, HW)
    if HW_p != HW:
        x3 = jnp.pad(x3, ((0, 0), (0, 0), (0, HW_p - HW)))
    x4 = x3.reshape(N, C_in, R, _LANE)

    # Weights/bias as flat f32 scalars for SMEM (read per-element in-kernel).
    w_flat = weight.reshape(C_out * C_in).astype(jnp.float32)
    b1 = bias.reshape(C_out).astype(jnp.float32)

    itemsize = jnp.dtype(x_nchw.dtype).itemsize
    t_n, t_rows = _choose_tiles(N, R, C_in, C_out, itemsize)
    grid = (pl.cdiv(N, t_n), pl.cdiv(R, t_rows))

    flops = 2 * N * HW * C_in * C_out
    bytes_accessed = (
        N * HW_p * (C_in + C_out) * itemsize
        + w_flat.size * 4
        + b1.size * 4
    )

    y4 = pl.pallas_call(
        _outconv_kernel,
        out_shape=jax.ShapeDtypeStruct((N, C_out, R, _LANE), x_nchw.dtype),
        grid_spec=pltpu.PrefetchScalarGridSpec(
            num_scalar_prefetch=0,
            grid=grid,
            in_specs=[
                pl.BlockSpec((t_n, C_in, t_rows, _LANE), lambda i, j: (i, 0, j, 0)),
                pl.BlockSpec(memory_space=pltpu.MemorySpace.SMEM),   # weights
                pl.BlockSpec(memory_space=pltpu.MemorySpace.SMEM),   # bias
            ],
            out_specs=pl.BlockSpec((t_n, C_out, t_rows, _LANE), lambda i, j: (i, 0, j, 0)),
        ),
        compiler_params=pltpu.CompilerParams(
            # Channel reduction is inside the kernel; both grid axes are
            # independent -> shard across TensorCores on multi-TC chips (v7x).
            dimension_semantics=("parallel", "parallel"),
        ),
        cost_estimate=pl.CostEstimate(
            flops=int(flops), transcendentals=0, bytes_accessed=int(bytes_accessed)
        ),
    )(x4, w_flat, b1)

    # (N, C_out, R, 128) -> (N, C_out, H*W) -> NCHW: free reshapes (+ slice if padded).
    y3 = y4.reshape(N, C_out, HW_p)
    if HW_p != HW:
        y3 = y3[:, :, :HW]
    return y3.reshape(N, C_out, H, W)


if __name__ == "__main__":
    # Module: OutConv(in_channels=4, out_channels=2); input x: (2, 4, 16, 16) NCHW.
    key = jax.random.PRNGKey(0)
    kx, kw, kb = jax.random.split(key, 3)

    N, C_in, C_out, Hs, Ws = 2, 4, 2, 16, 16

    x = jax.random.normal(kx, (N, C_in, Hs, Ws), dtype=jnp.float32)
    # Deterministic param init mimicking nn.Conv2d default (uniform in +-1/sqrt(fan_in)).
    bound = 1.0 / jnp.sqrt(jnp.float32(C_in * 1 * 1))
    weight = jax.random.uniform(kw, (C_out, C_in, 1, 1), jnp.float32, -bound, bound)
    bias = jax.random.uniform(kb, (C_out,), jnp.float32, -bound, bound)

    y = outconv_pallas(x, weight, bias)
    y = jax.block_until_ready(y)

    # Reference: plain-JAX 1x1 conv (einsum over channels).
    y_ref = (
        jnp.einsum("nchw,oc->nohw", x, weight.reshape(C_out, C_in))
        + bias[None, :, None, None]
    )
    assert y.shape == (N, C_out, Hs, Ws)
    assert jnp.allclose(y, y_ref, atol=1e-5, rtol=1e-5)

    print("KERNEL_OK")
</pallas_src>

<mosaic_0001>
module attributes {stable_mosaic.version = 11 : i64} {
  func.func @_outconv_kernel(%arg0: i32, %arg1: i32, %arg2: memref<2x4x2x128xf32, #tpu.memory_space<vmem>>, %arg3: memref<8xf32, #tpu.memory_space<smem>>, %arg4: memref<2xf32, #tpu.memory_space<smem>>, %arg5: memref<2x2x2x128xf32, #tpu.memory_space<vmem>>) attributes {dimension_semantics = [#tpu.dimension_semantics<parallel>, #tpu.dimension_semantics<parallel>], iteration_bounds = array<i64: 1, 1>, scalar_prefetch = 0 : i64, scratch_operands = 0 : i64, tpu.core_type = #tpu.core_type<tc>, window_params = [{transform_indices = @transform_0, window_bounds = array<i64: 2, 4, 2, 128>}, {transform_indices = @transform_1, window_bounds = array<i64: 8>}, {transform_indices = @transform_2, window_bounds = array<i64: 2>}, {transform_indices = @transform_3, window_bounds = array<i64: 2, 2, 2, 128>}]} {
    %c0 = arith.constant 0 : index
    %c0_0 = arith.constant 0 : index
    %c0_1 = arith.constant 0 : index
    %c0_2 = arith.constant 0 : index
    %0 = vector.load %arg2[%c0, %c0_0, %c0_1, %c0_2] : memref<2x4x2x128xf32, #tpu.memory_space<vmem>>, vector<1x1x2x128xf32>
    %1 = vector.shape_cast %0 : vector<1x1x2x128xf32> to vector<2x128xf32>
    %c0_3 = arith.constant 0 : index
    %2 = memref.load %arg3[%c0_3] : memref<8xf32, #tpu.memory_space<smem>>
    %3 = vector.broadcast %2 : f32 to vector<2x128xf32>
    %4 = arith.mulf %1, %3 : vector<2x128xf32>
    %c0_4 = arith.constant 0 : index
    %c1 = arith.constant 1 : index
    %c0_5 = arith.constant 0 : index
    %c0_6 = arith.constant 0 : index
    %5 = vector.load %arg2[%c0_4, %c1, %c0_5, %c0_6] : memref<2x4x2x128xf32, #tpu.memory_space<vmem>>, vector<1x1x2x128xf32>
    %6 = vector.shape_cast %5 : vector<1x1x2x128xf32> to vector<2x128xf32>
    %c1_7 = arith.constant 1 : index
    %7 = memref.load %arg3[%c1_7] : memref<8xf32, #tpu.memory_space<smem>>
    %8 = vector.broadcast %7 : f32 to vector<2x128xf32>
    %9 = arith.mulf %6, %8 : vector<2x128xf32>
    %10 = arith.addf %4, %9 : vector<2x128xf32>
    %c0_8 = arith.constant 0 : index
    %c2 = arith.constant 2 : index
    %c0_9 = arith.constant 0 : index
    %c0_10 = arith.constant 0 : index
    %11 = vector.load %arg2[%c0_8, %c2, %c0_9, %c0_10] : memref<2x4x2x128xf32, #tpu.memory_space<vmem>>, vector<1x1x2x128xf32>
    %12 = vector.shape_cast %11 : vector<1x1x2x128xf32> to vector<2x128xf32>
    %c2_11 = arith.constant 2 : index
    %13 = memref.load %arg3[%c2_11] : memref<8xf32, #tpu.memory_space<smem>>
    %14 = vector.broadcast %13 : f32 to vector<2x128xf32>
    %15 = arith.mulf %12, %14 : vector<2x128xf32>
    %16 = arith.addf %10, %15 : vector<2x128xf32>
    %c0_12 = arith.constant 0 : index
    %c3 = arith.constant 3 : index
    %c0_13 = arith.constant 0 : index
    %c0_14 = arith.constant 0 : index
    %17 = vector.load %arg2[%c0_12, %c3, %c0_13, %c0_14] : memref<2x4x2x128xf32, #tpu.memory_space<vmem>>, vector<1x1x2x128xf32>
    %18 = vector.shape_cast %17 : vector<1x1x2x128xf32> to vector<2x128xf32>
    %c3_15 = arith.constant 3 : index
    %19 = memref.load %arg3[%c3_15] : memref<8xf32, #tpu.memory_space<smem>>
    %20 = vector.broadcast %19 : f32 to vector<2x128xf32>
    %21 = arith.mulf %18, %20 : vector<2x128xf32>
    %22 = arith.addf %16, %21 : vector<2x128xf32>
    %c0_16 = arith.constant 0 : index
    %23 = memref.load %arg4[%c0_16] : memref<2xf32, #tpu.memory_space<smem>>
    %24 = vector.broadcast %23 : f32 to vector<2x128xf32>
    %25 = arith.addf %22, %24 : vector<2x128xf32>
    %c0_17 = arith.constant 0 : index
    %c0_18 = arith.constant 0 : index
    %c0_19 = arith.constant 0 : index
    %c0_20 = arith.constant 0 : index
    %26 = vector.load %arg5[%c0_17, %c0_18, %c0_19, %c0_20] : memref<2x2x2x128xf32, #tpu.memory_space<vmem>>, vector<1x1x2x128xf32>
    %27 = vector.shape_cast %26 : vector<1x1x2x128xf32> to vector<2x128xf32>
    %28 = vector.shape_cast %25 : vector<2x128xf32> to vector<1x1x2x128xf32>
    tpu.vector_store %arg5[%c0_17, %c0_18, %c0_19, %c0_20], %28 {strides = array<i32>} : memref<2x2x2x128xf32, #tpu.memory_space<vmem>>, vector<1x1x2x128xf32>,
    %c0_21 = arith.constant 0 : index
    %c0_22 = arith.constant 0 : index
    %c0_23 = arith.constant 0 : index
    %c0_24 = arith.constant 0 : index
    %29 = vector.load %arg2[%c0_21, %c0_22, %c0_23, %c0_24] : memref<2x4x2x128xf32, #tpu.memory_space<vmem>>, vector<1x1x2x128xf32>
    %30 = vector.shape_cast %29 : vector<1x1x2x128xf32> to vector<2x128xf32>
    %c4 = arith.constant 4 : index
    %31 = memref.load %arg3[%c4] : memref<8xf32, #tpu.memory_space<smem>>
    %32 = vector.broadcast %31 : f32 to vector<2x128xf32>
    %33 = arith.mulf %30, %32 : vector<2x128xf32>
    %c0_25 = arith.constant 0 : index
    %c1_26 = arith.constant 1 : index
    %c0_27 = arith.constant 0 : index
    %c0_28 = arith.constant 0 : index
    %34 = vector.load %arg2[%c0_25, %c1_26, %c0_27, %c0_28] : memref<2x4x2x128xf32, #tpu.memory_space<vmem>>, vector<1x1x2x128xf32>
    %35 = vector.shape_cast %34 : vector<1x1x2x128xf32> to vector<2x128xf32>
    %c5 = arith.constant 5 : index
    %36 = memref.load %arg3[%c5] : memref<8xf32, #tpu.memory_space<smem>>
    %37 = vector.broadcast %36 : f32 to vector<2x128xf32>
    %38 = arith.mulf %35, %37 : vector<2x128xf32>
    %39 = arith.addf %33, %38 : vector<2x128xf32>
    %c0_29 = arith.constant 0 : index
    %c2_30 = arith.constant 2 : index
    %c0_31 = arith.constant 0 : index
    %c0_32 = arith.constant 0 : index
    %40 = vector.load %arg2[%c0_29, %c2_30, %c0_31, %c0_32] : memref<2x4x2x128xf32, #tpu.memory_space<vmem>>, vector<1x1x2x128xf32>
    %41 = vector.shape_cast %40 : vector<1x1x2x128xf32> to vector<2x128xf32>
    %c6 = arith.constant 6 : index
    %42 = memref.load %arg3[%c6] : memref<8xf32, #tpu.memory_space<smem>>
    %43 = vector.broadcast %42 : f32 to vector<2x128xf32>
    %44 = arith.mulf %41, %43 : vector<2x128xf32>
    %45 = arith.addf %39, %44 : vector<2x128xf32>
    %c0_33 = arith.constant 0 : index
    %c3_34 = arith.constant 3 : index
    %c0_35 = arith.constant 0 : index
    %c0_36 = arith.constant 0 : index
    %46 = vector.load %arg2[%c0_33, %c3_34, %c0_35, %c0_36] : memref<2x4x2x128xf32, #tpu.memory_space<vmem>>, vector<1x1x2x128xf32>
    %47 = vector.shape_cast %46 : vector<1x1x2x128xf32> to vector<2x128xf32>
    %c7 = arith.constant 7 : index
    %48 = memref.load %arg3[%c7] : memref<8xf32, #tpu.memory_space<smem>>
    %49 = vector.broadcast %48 : f32 to vector<2x128xf32>
    %50 = arith.mulf %47, %49 : vector<2x128xf32>
    %51 = arith.addf %45, %50 : vector<2x128xf32>
    %c1_37 = arith.constant 1 : index
    %52 = memref.load %arg4[%c1_37] : memref<2xf32, #tpu.memory_space<smem>>
    %53 = vector.broadcast %52 : f32 to vector<2x128xf32>
    %54 = arith.addf %51, %53 : vector<2x128xf32>
    %c0_38 = arith.constant 0 : index
    %c1_39 = arith.constant 1 : index
    %c0_40 = arith.constant 0 : index
    %c0_41 = arith.constant 0 : index
    %55 = vector.load %arg5[%c0_38, %c1_39, %c0_40, %c0_41] : memref<2x2x2x128xf32, #tpu.memory_space<vmem>>, vector<1x1x2x128xf32>
    %56 = vector.shape_cast %55 : vector<1x1x2x128xf32> to vector<2x128xf32>
    %57 = vector.shape_cast %54 : vector<2x128xf32> to vector<1x1x2x128xf32>
    tpu.vector_store %arg5[%c0_38, %c1_39, %c0_40, %c0_41], %57 {strides = array<i32>} : memref<2x2x2x128xf32, #tpu.memory_space<vmem>>, vector<1x1x2x128xf32>,
    %c1_42 = arith.constant 1 : index
    %c0_43 = arith.constant 0 : index
    %c0_44 = arith.constant 0 : index
    %c0_45 = arith.constant 0 : index
    %58 = vector.load %arg2[%c1_42, %c0_43, %c0_44, %c0_45] : memref<2x4x2x128xf32, #tpu.memory_space<vmem>>, vector<1x1x2x128xf32>
    %59 = vector.shape_cast %58 : vector<1x1x2x128xf32> to vector<2x128xf32>
    %c0_46 = arith.constant 0 : index
    %60 = memref.load %arg3[%c0_46] : memref<8xf32, #tpu.memory_space<smem>>
    %61 = vector.broadcast %60 : f32 to vector<2x128xf32>
    %62 = arith.mulf %59, %61 : vector<2x128xf32>
    %c1_47 = arith.constant 1 : index
    %c1_48 = arith.constant 1 : index
    %c0_49 = arith.constant 0 : index
    %c0_50 = arith.constant 0 : index
    %63 = vector.load %arg2[%c1_47, %c1_48, %c0_49, %c0_50] : memref<2x4x2x128xf32, #tpu.memory_space<vmem>>, vector<1x1x2x128xf32>
    %64 = vector.shape_cast %63 : vector<1x1x2x128xf32> to vector<2x128xf32>
    %c1_51 = arith.constant 1 : index
    %65 = memref.load %arg3[%c1_51] : memref<8xf32, #tpu.memory_space<smem>>
    %66 = vector.broadcast %65 : f32 to vector<2x128xf32>
    %67 = arith.mulf %64, %66 : vector<2x128xf32>
    %68 = arith.addf %62, %67 : vector<2x128xf32>
    %c1_52 = arith.constant 1 : index
    %c2_53 = arith.constant 2 : index
    %c0_54 = arith.constant 0 : index
    %c0_55 = arith.constant 0 : index
    %69 = vector.load %arg2[%c1_52, %c2_53, %c0_54, %c0_55] : memref<2x4x2x128xf32, #tpu.memory_space<vmem>>, vector<1x1x2x128xf32>
    %70 = vector.shape_cast %69 : vector<1x1x2x128xf32> to vector<2x128xf32>
    %c2_56 = arith.constant 2 : index
    %71 = memref.load %arg3[%c2_56] : memref<8xf32, #tpu.memory_space<smem>>
    %72 = vector.broadcast %71 : f32 to vector<2x128xf32>
    %73 = arith.mulf %70, %72 : vector<2x128xf32>
    %74 = arith.addf %68, %73 : vector<2x128xf32>
    %c1_57 = arith.constant 1 : index
    %c3_58 = arith.constant 3 : index
    %c0_59 = arith.constant 0 : index
    %c0_60 = arith.constant 0 : index
    %75 = vector.load %arg2[%c1_57, %c3_58, %c0_59, %c0_60] : memref<2x4x2x128xf32, #tpu.memory_space<vmem>>, vector<1x1x2x128xf32>
    %76 = vector.shape_cast %75 : vector<1x1x2x128xf32> to vector<2x128xf32>
    %c3_61 = arith.constant 3 : index
    %77 = memref.load %arg3[%c3_61] : memref<8xf32, #tpu.memory_space<smem>>
    %78 = vector.broadcast %77 : f32 to vector<2x128xf32>
    %79 = arith.mulf %76, %78 : vector<2x128xf32>
    %80 = arith.addf %74, %79 : vector<2x128xf32>
    %c0_62 = arith.constant 0 : index
    %81 = memref.load %arg4[%c0_62] : memref<2xf32, #tpu.memory_space<smem>>
    %82 = vector.broadcast %81 : f32 to vector<2x128xf32>
    %83 = arith.addf %80, %82 : vector<2x128xf32>
    %c1_63 = arith.constant 1 : index
    %c0_64 = arith.constant 0 : index
    %c0_65 = arith.constant 0 : index
    %c0_66 = arith.constant 0 : index
    %84 = vector.load %arg5[%c1_63, %c0_64, %c0_65, %c0_66] : memref<2x2x2x128xf32, #tpu.memory_space<vmem>>, vector<1x1x2x128xf32>
    %85 = vector.shape_cast %84 : vector<1x1x2x128xf32> to vector<2x128xf32>
    %86 = vector.shape_cast %83 : vector<2x128xf32> to vector<1x1x2x128xf32>
    tpu.vector_store %arg5[%c1_63, %c0_64, %c0_65, %c0_66], %86 {strides = array<i32>} : memref<2x2x2x128xf32, #tpu.memory_space<vmem>>, vector<1x1x2x128xf32>,
    %c1_67 = arith.constant 1 : index
    %c0_68 = arith.constant 0 : index
    %c0_69 = arith.constant 0 : index
    %c0_70 = arith.constant 0 : index
    %87 = vector.load %arg2[%c1_67, %c0_68, %c0_69, %c0_70] : memref<2x4x2x128xf32, #tpu.memory_space<vmem>>, vector<1x1x2x128xf32>
    %88 = vector.shape_cast %87 : vector<1x1x2x128xf32> to vector<2x128xf32>
    %c4_71 = arith.constant 4 : index
    %89 = memref.load %arg3[%c4_71] : memref<8xf32, #tpu.memory_space<smem>>
    %90 = vector.broadcast %89 : f32 to vector<2x128xf32>
    %91 = arith.mulf %88, %90 : vector<2x128xf32>
    %c1_72 = arith.constant 1 : index
    %c1_73 = arith.constant 1 : index
    %c0_74 = arith.constant 0 : index
    %c0_75 = arith.constant 0 : index
    %92 = vector.load %arg2[%c1_72, %c1_73, %c0_74, %c0_75] : memref<2x4x2x128xf32, #tpu.memory_space<vmem>>, vector<1x1x2x128xf32>
    %93 = vector.shape_cast %92 : vector<1x1x2x128xf32> to vector<2x128xf32>
    %c5_76 = arith.constant 5 : index
    %94 = memref.load %arg3[%c5_76] : memref<8xf32, #tpu.memory_space<smem>>
    %95 = vector.broadcast %94 : f32 to vector<2x128xf32>
    %96 = arith.mulf %93, %95 : vector<2x128xf32>
    %97 = arith.addf %91, %96 : vector<2x128xf32>
    %c1_77 = arith.constant 1 : index
    %c2_78 = arith.constant 2 : index
    %c0_79 = arith.constant 0 : index
    %c0_80 = arith.constant 0 : index
    %98 = vector.load %arg2[%c1_77, %c2_78, %c0_79, %c0_80] : memref<2x4x2x128xf32, #tpu.memory_space<vmem>>, vector<1x1x2x128xf32>
    %99 = vector.shape_cast %98 : vector<1x1x2x128xf32> to vector<2x128xf32>
    %c6_81 = arith.constant 6 : index
    %100 = memref.load %arg3[%c6_81] : memref<8xf32, #tpu.memory_space<smem>>
    %101 = vector.broadcast %100 : f32 to vector<2x128xf32>
    %102 = arith.mulf %99, %101 : vector<2x128xf32>
    %103 = arith.addf %97, %102 : vector<2x128xf32>
    %c1_82 = arith.constant 1 : index
    %c3_83 = arith.constant 3 : index
    %c0_84 = arith.constant 0 : index
    %c0_85 = arith.constant 0 : index
    %104 = vector.load %arg2[%c1_82, %c3_83, %c0_84, %c0_85] : memref<2x4x2x128xf32, #tpu.memory_space<vmem>>, vector<1x1x2x128xf32>
    %105 = vector.shape_cast %104 : vector<1x1x2x128xf32> to vector<2x128xf32>
    %c7_86 = arith.constant 7 : index
    %106 = memref.load %arg3[%c7_86] : memref<8xf32, #tpu.memory_space<smem>>
    %107 = vector.broadcast %106 : f32 to vector<2x128xf32>
    %108 = arith.mulf %105, %107 : vector<2x128xf32>
    %109 = arith.addf %103, %108 : vector<2x128xf32>
    %c1_87 = arith.constant 1 : index
    %110 = memref.load %arg4[%c1_87] : memref<2xf32, #tpu.memory_space<smem>>
    %111 = vector.broadcast %110 : f32 to vector<2x128xf32>
    %112 = arith.addf %109, %111 : vector<2x128xf32>
    %c1_88 = arith.constant 1 : index
    %c1_89 = arith.constant 1 : index
    %c0_90 = arith.constant 0 : index
    %c0_91 = arith.constant 0 : index
    %113 = vector.load %arg5[%c1_88, %c1_89, %c0_90, %c0_91] : memref<2x2x2x128xf32, #tpu.memory_space<vmem>>, vector<1x1x2x128xf32>
    %114 = vector.shape_cast %113 : vector<1x1x2x128xf32> to vector<2x128xf32>
    %115 = vector.shape_cast %112 : vector<2x128xf32> to vector<1x1x2x128xf32>
    tpu.vector_store %arg5[%c1_88, %c1_89, %c0_90, %c0_91], %115 {strides = array<i32>} : memref<2x2x2x128xf32, #tpu.memory_space<vmem>>, vector<1x1x2x128xf32>,
    return
  }
  func.func @transform_0(%arg0: i32, %arg1: i32) -> (i32, i32, i32, i32) {
    %c0_i32 = arith.constant 0 : i32
    %c0_i32_0 = arith.constant 0 : i32
    %c0_i32_1 = arith.constant 0 : i32
    return %arg0, %c0_i32, %arg1, %c0_i32_0 : i32, i32, i32, i32
  }
  func.func @transform_1(%arg0: i32, %arg1: i32) -> i32 {
    %c0_i32 = arith.constant 0 : i32
    %c0_i32_0 = arith.constant 0 : i32
    return %c0_i32 : i32
  }
  func.func @transform_2(%arg0: i32, %arg1: i32) -> i32 {
    %c0_i32 = arith.constant 0 : i32
    %c0_i32_0 = arith.constant 0 : i32
    return %c0_i32 : i32
  }
  func.func @transform_3(%arg0: i32, %arg1: i32) -> (i32, i32, i32, i32) {
    %c0_i32 = arith.constant 0 : i32
    %c0_i32_0 = arith.constant 0 : i32
    %c0_i32_1 = arith.constant 0 : i32
    return %arg0, %c0_i32, %arg1, %c0_i32_0 : i32, i32, i32, i32
  }
}

</mosaic_0001>

<bundles_post_ra>
// kernel: tpu_custom_call.1
= control target key start
LH: loop header
LB: loop body
LE: loop exit
PB: predicated region body
PF: predicated region fallthrough
CT: control target
= control target key end

     0   :  { %8 = vsyncpa [#allocation3], 0  ;;  %s356_s0 = inlined_call_operand.hbm [shape: f32[2,4,2,128], index: 0, kind: input, shape index: {}]   ;;  %s357_s1 = inlined_call_operand.vmem [shape: f32[8], index: 1, kind: input, shape index: {}]   ;;  %s358_s2 = inlined_call_operand.vmem [shape: f32[2], index: 2, kind: input, shape index: {}]   ;;  %s359_s3 = inlined_call_operand.hbm [shape: f32[2,2,2,128], index: 3, kind: output, shape index: {}]  }
   0x1   :  { %9 = vsyncpa [#allocation5], 0 }
   0x2   :  { %10 = vsyncpa [#allocation8], 0 }
   0x3   :  { %11 = vsyncpa [#allocation4], 0  ;;  %s273_s12 = smov [#allocation2]   ;;  %s30_s16 = sshll.u32 %s357_s1, 4  ;;  %s31_s16 = int_to_ptr.vmem [resolvable:$true] %s30_s16 }
   0x4   :  { %s17_s13 = sshll.u32 %s273_s12, 4  ;;  %s197_s19 = scalar_lea.hbm %s356_s0, 256  ;;  %s18_s13 = int_to_ptr.vmem [resolvable:$true] %s17_s13 }
   0x5   :  { %p198_p0 = scmp.ne.s32.totalorder %s356_s0, %s197_s19  ;;  %p201_p1 = scmp.lt.u32.totalorder %s197_s19, %s356_s0 }
   0x7   :  { %p203_p2 = pnand %p201_p1, %p198_p0 }
   0x9   :  { %206 = shalt.err (!%p203_p2)
}
   0xa   :  { %s207_s24 = scalar_lea.vmem %s18_s13, 256  ;;  %p212_p4 = scmp.lt.s32.totalorder %s18_s13, %s18_s13 }
   0xb   :  { %p208_p3 = scmp.ne.s32.totalorder %s18_s13, %s207_s24  ;;  %p213_p5 = scmp.lt.s32.totalorder %s207_s24, %s207_s24 }
   0xd   :  { %p214_p6 = por %p213_p5, %p212_p4 }
   0xf   :  { %p215_p7 = pnand %p214_p6, %p208_p3 }
  0x11   :  { %218 = shalt.err (!%p215_p7)
}
  0x12   :  { %s274_s1 = smov 32   ;;  %s275_s25 = smov 2  }
  0x13   :  { %23 = dma.hbm_to_vmem [thread:$0]  %s356_s0, 256, %s18_s13, [#allocation3], %s274_s1, %s274_s1, %s275_s25  }
  0x14   :  { %s219_s28 = scalar_lea.vmem %s31_s16, 16  ;;  %p224_p9 = scmp.lt.s32.totalorder %s31_s16, %s31_s16 }
  0x15   :  { %p220_p8 = scmp.ne.s32.totalorder %s31_s16, %s219_s28  ;;  %p225_p10 = scmp.lt.s32.totalorder %s219_s28, %s219_s28 }
  0x17   :  { %p226_p11 = por %p225_p10, %p224_p9 }
  0x19   :  { %p227_p12 = pnand %p226_p11, %p220_p8 }
  0x1b   :  { %230 = shalt.err (!%p227_p12)
}
  0x1c   :  { %s276_s29 = smov [#allocation6]   ;;  %s40_s5 = sshll.u32 %s358_s2, 4  ;;  %s41_s5 = int_to_ptr.vmem [resolvable:$true] %s40_s5 }
  0x1d   :  { %33 = dma.vmem_to_smem %s31_s16, 16, %s276_s29, [#allocation5]  }
  0x1e   :  { %s231_s6 = scalar_lea.vmem %s41_s5, 16  ;;  %p236_p0 = scmp.lt.s32.totalorder %s41_s5, %s41_s5 }
  0x1f   :  { %p232_p13 = scmp.ne.s32.totalorder %s41_s5, %s231_s6  ;;  %p237_p1 = scmp.lt.s32.totalorder %s231_s6, %s231_s6 }
  0x21   :  { %p238_p2 = por %p237_p1, %p236_p0 }
  0x23   :  { %p239_p3 = pnand %p238_p2, %p232_p13 }
  0x25   :  { %242 = shalt.err (!%p239_p3)
}
  0x26   :  { %s277_s0 = smov [#allocation7]  }
  0x27   :  { %43 = dma.vmem_to_smem %s41_s5, 16, %s277_s0, [#allocation8]  }
  0x28   :  { %265 = dma.done.wait [#allocation3], 256  }
  0x29   :  { %266 = vsyncadd [#allocation3], 4294967040 }
  0x2a   :  { %267 = dma.done.wait [#allocation5], 16  }
  0x2b   :  { %268 = vsyncadd [#allocation5], 4294967280 }
  0x2c   :  { %269 = dma.done.wait [#allocation8], 16  }
  0x2d   :  { %270 = vsyncadd [#allocation8], 4294967280 }
  0x2e   :  { %53 = sfence }
  0x2f   :  { %s55_s7 = sld [smem:[#allocation6]]  ;;  %s175_s8 = sld [smem:[#allocation6 + $0x1]]  ;;  %v54_v0 = vld [vmem:[#allocation2] sm:$0x3]  ;;  %v59_v1 = vld [vmem:[#allocation2 + $0x2] sm:$0x3] }
  0x30   :  { %s176_s2 = sld [smem:[#allocation6 + $0x2]]  ;;  %s320_s9 = sld [smem:[#allocation6 + $0x3]]  ;;  %v65_v2 = vld [vmem:[#allocation2 + $0x4] sm:$0x3]  ;;  %v71_v3 = vld [vmem:[#allocation2 + $0x6] sm:$0x3] }
  0x31   :  { %s322_s10 = sld [smem:[#allocation7]]  ;;  %s324_s11 = sld [smem:[#allocation6 + $0x4]]  ;;  %v105_v5 = vld [vmem:[#allocation2 + $0x8] sm:$0x3]  ;;  %v110_v6 = vld [vmem:[#allocation2 + $0xa] sm:$0x3] }
  0x32   :  { %s326_s12 = sld [smem:[#allocation6 + $0x5]]  ;;  %s328_s13 = sld [smem:[#allocation6 + $0x6]]  ;;  %v116_v7 = vld [vmem:[#allocation2 + $0xc] sm:$0x3]  ;;  %v80_v11 = vld [vmem:[#allocation2] sm:$0x3] }
  0x33   :  { %s330_s14 = sld [smem:[#allocation6 + $0x7]]  ;;  %v84_v15 = vld [vmem:[#allocation2 + $0x2] sm:$0x3]  ;;  %v89_v16 = vld [vmem:[#allocation2 + $0x4] sm:$0x3]  ;;  %s333_s15 = sld [smem:[#allocation7 + $0x1]] }
  0x34   :  { %v94_v20 = vld [vmem:[#allocation2 + $0x6] sm:$0x3]  ;;  %v122_v23 = vld [vmem:[#allocation2 + $0xe] sm:$0x3]  ;;  %v132_v28 = vld [vmem:[#allocation2 + $0x8] sm:$0x3] }
  0x35   :  { %v56_v4 = vstv %s55_s7  ;;  %v61_v9 = vstv %s175_s8  ;;  %v136_v29 = vld [vmem:[#allocation2 + $0xa] sm:$0x3]  ;;  %v141_v30 = vld [vmem:[#allocation2 + $0xc] sm:$0x3]  ;;  %v146_v39 = vld [vmem:[#allocation2 + $0xe] sm:$0x3] }
  0x36   :  { %v57_v8 = vmul.f32 %v56_v4, %v54_v0  ;;  %v67_v10 = vstv %s176_s2  ;;  %v62_v12 = vmul.f32 %v61_v9, %v59_v1  ;;  %v73_v14 = vstv %s320_s9  ;;  %s278_s16 = smov [#allocation9]  }
  0x37   :  { %v68_v13 = vmul.f32 %v67_v10, %v65_v2  ;;  %v108_v17 = vmul.f32 %v105_v5, %v56_v4  ;;  %v74_v18 = vmul.f32 %v73_v14, %v71_v3  ;;  %v82_v19 = vstv %s324_s11  ;;  %s161_s17 = sshll.u32 %s278_s16, 4  ;;  %s162_s17 = int_to_ptr.vmem [resolvable:$true] %s161_s17 }
  0x38   :  { %v113_v21 = vmul.f32 %v110_v6, %v61_v9  ;;  %v119_v22 = vmul.f32 %v116_v7, %v67_v10  ;;  %v63_v24 = vadd.f32 %v62_v12, %v57_v8  ;;  %v83_v25 = vmul.f32 %v82_v19, %v80_v11  ;;  %s243_s18 = scalar_lea.vmem %s162_s17, 128  ;;  %p248_p5 = scmp.lt.s32.totalorder %s162_s17, %s162_s17 }
  0x39   :  { %v86_v26 = vstv %s326_s12  ;;  %v91_v27 = vstv %s328_s13  ;;  %v77_v31 = vstv %s322_s10  ;;  %v96_v34 = vstv %s330_s14  ;;  %p244_p4 = scmp.ne.s32.totalorder %s162_s17, %s243_s18  ;;  %p249_p6 = scmp.lt.s32.totalorder %s243_s18, %s243_s18 }
  0x3a   :  { %v87_v32 = vmul.f32 %v86_v26, %v84_v15  ;;  %v92_v33 = vmul.f32 %v91_v27, %v89_v16  ;;  %v69_v35 = vadd.f32 %v68_v13, %v63_v24  ;;  %v97_v36 = vmul.f32 %v96_v34, %v94_v20 }
  0x3b   :  { %v114_v37 = vadd.f32 %v113_v21, %v108_v17  ;;  %v125_v38 = vmul.f32 %v122_v23, %v73_v14  ;;  %v135_v41 = vmul.f32 %v132_v28, %v82_v19  ;;  %v139_v42 = vmul.f32 %v136_v29, %v86_v26  ;;  %p250_p7 = por %p249_p6, %p248_p5 }
  0x3c   :  { %v88_v40 = vadd.f32 %v87_v32, %v83_v25  ;;  %v144_v43 = vmul.f32 %v141_v30, %v91_v27  ;;  %v75_v44 = vadd.f32 %v74_v18, %v69_v35  ;;  %v149_v48 = vmul.f32 %v146_v39, %v96_v34 }
  0x3d   :  { %v120_v45 = vadd.f32 %v119_v22, %v114_v37  ;;  %v140_v47 = vadd.f32 %v139_v42, %v135_v41  ;;  %v100_v50 = vstv %s333_s15  ;;  %p251_p8 = pnand %p250_p7, %p244_p4 }
  0x3e   :  { %v93_v46 = vadd.f32 %v92_v33, %v88_v40  ;;  %v78_v49 = vadd.f32 %v77_v31, %v75_v44 }
  0x3f   :  { %v126_v51 = vadd.f32 %v125_v38, %v120_v45  ;;  %v145_v53 = vadd.f32 %v144_v43, %v140_v47 }
  0x40   :  { %v98_v52 = vadd.f32 %v97_v36, %v93_v46  ;;  %79 = vst [vmem:[#allocation9] sm:$0x3] %v78_v49 }
  0x41   :  { %v129_v54 = vadd.f32 %v126_v51, %v77_v31  ;;  %v150_v56 = vadd.f32 %v149_v48, %v145_v53 }
  0x42   :  { %v101_v55 = vadd.f32 %v100_v50, %v98_v52 }
  0x43   :  { %131 = vst [vmem:[#allocation9 + $0x4] sm:$0x3] %v129_v54  ;;  %v153_v57 = vadd.f32 %v150_v56, %v100_v50 }
  0x44   :  { %103 = vst [vmem:[#allocation9 + $0x2] sm:$0x3] %v101_v55 }
  0x45   :  { %155 = vst [vmem:[#allocation9 + $0x6] sm:$0x3] %v153_v57 }
  0x46   :  { %254 = shalt.err (!%p251_p8)
}
  0x47   :  { %s255_s21 = scalar_lea.hbm %s359_s3, 128 }
  0x48   :  { %p256_p9 = scmp.ne.s32.totalorder %s359_s3, %s255_s21  ;;  %p259_p10 = scmp.lt.u32.totalorder %s255_s21, %s359_s3 }
  0x4a   :  { %p261_p11 = pnand %p259_p10, %p256_p9 }
  0x4c   :  { %264 = shalt.err (!%p261_p11)
}
  0x4d   :  { %167 = dma.vmem_to_hbm [thread:$0]  %s162_s17, 128, %s359_s3, [#allocation4], %s274_s1, %s274_s1, %s275_s25  }
  0x4e   :  { %271 = dma.done.wait [#allocation4], 128  }
  0x4f   :  { %272 = vsyncadd [#allocation4], 4294967168 }
  0x50   :  { %171 = vsyncpa [#allocation3], 1 }
  0x51   :  { %172 = vsyncpa [#allocation4], 1 }
  0x52   :  { %173 = vsyncpa [#allocation5], 1 }
  0x53   :  { %174 = vsyncpa [#allocation8], 1 }

</bundles_post_ra>
